<compile_context>
chip_gen: v7x
topology: tpu7x:2x2x1
jax: 0.10.0
libtpu: 0.0.40
codegen_flags: <defaults>
</compile_context>

<pallas_src>
import functools

import jax
import jax.numpy as jnp
from jax.experimental import pallas as pl
from jax.experimental.pallas import tpu as pltpu


def _ce_fwd_bwd_kernel(inv_div_ref, targ_ref, logits_ref, loss_part_ref, grad_ref,
                       *, ignore_index, n_tokens, row_tile):
    # logits_ref:    (TM, C) block in VMEM
    # targ_ref:      (TM, 1) int32 block in VMEM
    # inv_div_ref:   (1, 1) float32 in SMEM (1 / divisor)
    # loss_part_ref: (1, 8, 128) float32 per-block partial loss (splat)
    # grad_ref:      (TM, C) block in VMEM
    logits = logits_ref[...].astype(jnp.float32)          # (TM, C)
    targ = targ_ref[...]                                  # (TM, 1) int32
    inv_div = inv_div_ref[0, 0]                           # scalar f32

    tm, c = logits.shape
    col = jax.lax.broadcasted_iota(jnp.int32, (tm, c), 1)
    # Note: rows with targ == ignore_index are fully masked below, so it is
    # fine for ignore_index to lie outside [0, C) (e.g. -100): is_target is
    # simply never true for those rows.
    is_target = col == targ                               # (TM, C) bool

    # Rows to zero out: ignore_index targets, plus out-of-range tail rows when
    # n_tokens % row_tile != 0 (their block contents are OOB padding garbage).
    masked_row = targ == ignore_index                     # (TM, 1) bool
    if n_tokens % row_tile != 0:
        row = jax.lax.broadcasted_iota(jnp.int32, (tm, 1), 0)
        in_range = (pl.program_id(0) * row_tile + row) < n_tokens
        masked_row = jnp.logical_or(masked_row, jnp.logical_not(in_range))

    row_max = jnp.max(logits, axis=1, keepdims=True)      # (TM, 1)
    exp_row = jnp.exp(logits - row_max)                   # (TM, C)
    sum_exp = jnp.sum(exp_row, axis=1, keepdims=True)     # (TM, 1)
    lse = row_max + jnp.log(sum_exp)                      # un-shifted logsumexp
    inv_sum = pl.reciprocal(sum_exp, approx=False)        # (TM, 1)

    # target logit via one-hot masked sum (gather-free)
    gt_logit = jnp.sum(jnp.where(is_target, logits, 0.0), axis=1, keepdims=True)

    loss = (lse - gt_logit) * inv_div                     # (TM, 1) f32
    loss = jnp.where(masked_row, 0.0, loss)

    p = exp_row * inv_sum                                 # softmax probabilities
    grad = jnp.where(is_target, p - 1.0, p) * inv_div     # one-hot folded in
    grad = jnp.where(masked_row, 0.0, grad)

    grad_ref[...] = grad.astype(grad_ref.dtype)
    # Lane-dense per-block partial loss: splat the scalar across one (8,128) tile.
    loss_part_ref[...] = jnp.broadcast_to(
        jnp.sum(loss), loss_part_ref.shape).astype(loss_part_ref.dtype)


def _choose_row_tile(n_tokens, n_classes, itemsize):
    # Per-row VMEM bytes: 2 double-buffered logits blocks + 2 grad blocks
    # (auto-pipelining) + ~3 full-tile f32 temporaries in the kernel body.
    budget_bytes = 40 * 1024 * 1024          # also fits v7x's 64 MiB/TC VMEM
    bytes_per_row = n_classes * (4 * itemsize + 12) + 64
    tm = budget_bytes // bytes_per_row
    tm = max(8, min(1024, int(tm)))
    tm = (tm // 8) * 8                        # sublane multiple
    n_rounded = ((n_tokens + 7) // 8) * 8
    return min(tm, max(8, n_rounded))


def triton_cross_entropy_loss(logits, targets, *, ignore_index, reduction="mean",
                              row_tile=None, vmem_limit_bytes=56 * 1024 * 1024):
    """Returns (scalar_loss, grad_logits) matching the PyTorch module's semantics.

    logits:  (..., n_classes) float
    targets: (...) int
    """
    assert reduction in ("mean", "sum")
    n_classes = logits.shape[-1]
    logits2d = logits.reshape(-1, n_classes)
    targ1d = targets.reshape(-1).astype(jnp.int32)
    n_tokens = logits2d.shape[0]

    if row_tile is None:
        row_tile = _choose_row_tile(n_tokens, n_classes,
                                    jnp.dtype(logits2d.dtype).itemsize)
    num_blocks = pl.cdiv(n_tokens, row_tile)

    # divisor (glue, plain JAX): count of non-ignored tokens for 'mean', else 1.
    if reduction == "mean":
        divisor = jnp.maximum(
            jnp.sum(targ1d != ignore_index).astype(jnp.float32), 1.0)
    else:
        divisor = jnp.float32(1.0)
    inv_div = (1.0 / divisor).astype(jnp.float32).reshape(1, 1)

    targ2d = targ1d.reshape(n_tokens, 1)

    kernel = functools.partial(_ce_fwd_bwd_kernel, ignore_index=ignore_index,
                               n_tokens=n_tokens, row_tile=row_tile)

    loss_parts, grad_logits = pl.pallas_call(
        kernel,
        out_shape=(
            jax.ShapeDtypeStruct((num_blocks, 8, 128), jnp.float32),
            jax.ShapeDtypeStruct((n_tokens, n_classes), logits2d.dtype),
        ),
        grid=(num_blocks,),
        in_specs=[
            pl.BlockSpec(memory_space=pltpu.MemorySpace.SMEM),        # inv_div
            pl.BlockSpec((row_tile, 1), lambda i: (i, 0)),            # targets
            pl.BlockSpec((row_tile, n_classes), lambda i: (i, 0)),    # logits
        ],
        out_specs=(
            pl.BlockSpec((1, 8, 128), lambda i: (i, 0, 0)),           # loss partials
            pl.BlockSpec((row_tile, n_classes), lambda i: (i, 0)),    # logit grad
        ),
        compiler_params=pltpu.CompilerParams(
            dimension_semantics=("parallel",),
            vmem_limit_bytes=vmem_limit_bytes),
    )(inv_div, targ2d, logits2d)

    loss = jnp.sum(loss_parts[:, 0, 0])   # matches `loss = loss.sum()` in forward()
    return loss, grad_logits


if __name__ == "__main__":
    key = jax.random.PRNGKey(0)
    k_logits, k_targ = jax.random.split(key)

    batch, seq, vocab = 2, 8, 32          # n_tokens = 16, n_classes = 32
    pad_token_id = 0
    reduction = "mean"

    logits = jax.random.normal(k_logits, (batch, seq, vocab), dtype=jnp.float32)
    targets = jax.random.randint(k_targ, (batch, seq), 0, vocab, dtype=jnp.int32)
    # force a few padding (ignored) positions
    targets = targets.at[0, :2].set(pad_token_id)

    loss, grad_logits = jax.jit(
        functools.partial(triton_cross_entropy_loss,
                          ignore_index=pad_token_id, reduction=reduction)
    )(logits, targets)
    jax.block_until_ready((loss, grad_logits))

    # reference check in plain JAX
    l2 = logits.reshape(-1, vocab).astype(jnp.float32)
    t1 = targets.reshape(-1)
    lse = jax.scipy.special.logsumexp(l2, axis=1)
    gt = jnp.take_along_axis(l2, t1[:, None], axis=1)[:, 0]
    div = jnp.maximum(jnp.sum(t1 != pad_token_id).astype(jnp.float32), 1.0)
    per_row = jnp.where(t1 == pad_token_id, 0.0, (lse - gt) / div)
    ref_loss = jnp.sum(per_row)
    softmax = jax.nn.softmax(l2, axis=1)
    one_hot = jax.nn.one_hot(t1, vocab, dtype=jnp.float32)
    ref_grad = jnp.where((t1 == pad_token_id)[:, None], 0.0,
                         (softmax - one_hot) / div)

    assert jnp.allclose(loss, ref_loss, atol=1e-5, rtol=1e-5), (loss, ref_loss)
    assert jnp.allclose(grad_logits, ref_grad, atol=1e-5, rtol=1e-5)

    print("KERNEL_OK")
</pallas_src>

<mosaic_0001>
module attributes {stable_mosaic.version = 11 : i64} {
  func.func @_ce_fwd_bwd_kernel(%arg0: i32, %arg1: memref<1x1xf32, #tpu.memory_space<smem>>, %arg2: memref<16x1xi32, #tpu.memory_space<vmem>>, %arg3: memref<16x32xf32, #tpu.memory_space<vmem>>, %arg4: memref<1x8x128xf32, #tpu.memory_space<vmem>>, %arg5: memref<16x32xf32, #tpu.memory_space<vmem>>) attributes {dimension_semantics = [#tpu.dimension_semantics<parallel>], iteration_bounds = array<i64: 1>, scalar_prefetch = 0 : i64, scratch_operands = 0 : i64, tpu.core_type = #tpu.core_type<tc>, window_params = [{transform_indices = @transform_0, window_bounds = array<i64: 1, 1>}, {transform_indices = @transform_1, window_bounds = array<i64: 16, 1>}, {transform_indices = @transform_2, window_bounds = array<i64: 16, 32>}, {transform_indices = @transform_3, window_bounds = array<i64: 1, 8, 128>}, {transform_indices = @transform_4, window_bounds = array<i64: 16, 32>}]} {
    %c0 = arith.constant 0 : index
    %c0_0 = arith.constant 0 : index
    %0 = vector.load %arg3[%c0, %c0_0] : memref<16x32xf32, #tpu.memory_space<vmem>>, vector<16x32xf32>
    %c0_1 = arith.constant 0 : index
    %c0_2 = arith.constant 0 : index
    %1 = vector.load %arg2[%c0_1, %c0_2] : memref<16x1xi32, #tpu.memory_space<vmem>>, vector<16x1xi32>
    %c0_3 = arith.constant 0 : index
    %c0_4 = arith.constant 0 : index
    %2 = memref.load %arg1[%c0_3, %c0_4] : memref<1x1xf32, #tpu.memory_space<smem>>
    %3 = tpu.iota {dimensions = array<i32: 1>} : vector<16x32xi32>
    %4 = vector.broadcast %1 : vector<16x1xi32> to vector<16x32xi32>
    %5 = arith.cmpi eq, %3, %4 : vector<16x32xi32>
    %c0_i32 = arith.constant 0 : i32
    %6 = vector.broadcast %c0_i32 : i32 to vector<16x1xi32>
    %7 = arith.cmpi eq, %1, %6 : vector<16x1xi32>
    %cst = arith.constant dense<0xFF800000> : vector<16xf32>
    %8 = vector.multi_reduction <maximumf>, %0, %cst [1] : vector<16x32xf32> to vector<16xf32>
    %9 = vector.shape_cast %8 : vector<16xf32> to vector<16x1xf32>
    %10 = vector.broadcast %9 : vector<16x1xf32> to vector<16x32xf32>
    %11 = arith.subf %0, %10 : vector<16x32xf32>
    %12 = math.exp %11 : vector<16x32xf32>
    %cst_5 = arith.constant dense<0.000000e+00> : vector<16xf32>
    %13 = vector.multi_reduction <add>, %12, %cst_5 [1] : vector<16x32xf32> to vector<16xf32>
    %14 = vector.shape_cast %13 : vector<16xf32> to vector<16x1xf32>
    %15 = math.log %14 : vector<16x1xf32>
    %16 = arith.addf %9, %15 : vector<16x1xf32>
    %17 = tpu.reciprocal %14 : vector<16x1xf32> -> vector<16x1xf32>
    %cst_6 = arith.constant 0.000000e+00 : f32
    %18 = vector.broadcast %cst_6 : f32 to vector<16x32xf32>
    %19 = arith.select %5, %0, %18 : vector<16x32xi1>, vector<16x32xf32>
    %cst_7 = arith.constant dense<0.000000e+00> : vector<16xf32>
    %20 = vector.multi_reduction <add>, %19, %cst_7 [1] : vector<16x32xf32> to vector<16xf32>
    %21 = vector.shape_cast %20 : vector<16xf32> to vector<16x1xf32>
    %22 = arith.subf %16, %21 : vector<16x1xf32>
    %23 = vector.broadcast %2 : f32 to vector<16x1xf32>
    %24 = arith.mulf %22, %23 : vector<16x1xf32>
    %cst_8 = arith.constant 0.000000e+00 : f32
    %25 = vector.broadcast %cst_8 : f32 to vector<16x1xf32>
    %26 = arith.select %7, %25, %24 : vector<16x1xi1>, vector<16x1xf32>
    %27 = vector.broadcast %17 : vector<16x1xf32> to vector<16x32xf32>
    %28 = arith.mulf %12, %27 : vector<16x32xf32>
    %cst_9 = arith.constant 1.000000e+00 : f32
    %29 = vector.broadcast %cst_9 : f32 to vector<16x32xf32>
    %30 = arith.subf %28, %29 : vector<16x32xf32>
    %31 = arith.select %5, %30, %28 : vector<16x32xi1>, vector<16x32xf32>
    %32 = vector.broadcast %2 : f32 to vector<16x32xf32>
    %33 = arith.mulf %31, %32 : vector<16x32xf32>
    %cst_10 = arith.constant 0.000000e+00 : f32
    %34 = vector.shape_cast %7 : vector<16x1xi1> to vector<16x1xi1>
    %35 = vector.broadcast %34 : vector<16x1xi1> to vector<16x32xi1>
    %36 = vector.broadcast %cst_10 : f32 to vector<16x32xf32>
    %37 = arith.select %35, %36, %33 : vector<16x32xi1>, vector<16x32xf32>
    %c0_11 = arith.constant 0 : index
    %c0_12 = arith.constant 0 : index
    %38 = vector.load %arg5[%c0_11, %c0_12] : memref<16x32xf32, #tpu.memory_space<vmem>>, vector<16x32xf32>
    tpu.vector_store %arg5[%c0_11, %c0_12], %37 {strides = array<i32>} : memref<16x32xf32, #tpu.memory_space<vmem>>, vector<16x32xf32>,
    %39 = vector.shape_cast %26 : vector<16x1xf32> to vector<1x16x1xf32>
    %cst_13 = arith.constant dense<0.000000e+00> : vector<1xf32>
    %40 = vector.multi_reduction <add>, %39, %cst_13 [1, 2] : vector<1x16x1xf32> to vector<1xf32>
    %41 = vector.shape_cast %40 : vector<1xf32> to vector<1x1x1xf32>
    %42 = vector.extract %41[0, 0, 0] : f32 from vector<1x1x1xf32>
    %43 = vector.broadcast %42 : f32 to vector<1x8x128xf32>
    %c0_14 = arith.constant 0 : index
    %c0_15 = arith.constant 0 : index
    %c0_16 = arith.constant 0 : index
    %44 = vector.load %arg4[%c0_14, %c0_15, %c0_16] : memref<1x8x128xf32, #tpu.memory_space<vmem>>, vector<1x8x128xf32>
    tpu.vector_store %arg4[%c0_14, %c0_15, %c0_16], %43 {strides = array<i32>} : memref<1x8x128xf32, #tpu.memory_space<vmem>>, vector<1x8x128xf32>,
    return
  }
  func.func @transform_0(%arg0: i32) -> (i32, i32) {
    %c0_i32 = arith.constant 0 : i32
    %c0_i32_0 = arith.constant 0 : i32
    %c0_i32_1 = arith.constant 0 : i32
    return %c0_i32, %c0_i32_0 : i32, i32
  }
  func.func @transform_1(%arg0: i32) -> (i32, i32) {
    %c0_i32 = arith.constant 0 : i32
    %c0_i32_0 = arith.constant 0 : i32
    return %arg0, %c0_i32 : i32, i32
  }
  func.func @transform_2(%arg0: i32) -> (i32, i32) {
    %c0_i32 = arith.constant 0 : i32
    %c0_i32_0 = arith.constant 0 : i32
    return %arg0, %c0_i32 : i32, i32
  }
  func.func @transform_3(%arg0: i32) -> (i32, i32, i32) {
    %c0_i32 = arith.constant 0 : i32
    %c0_i32_0 = arith.constant 0 : i32
    %c0_i32_1 = arith.constant 0 : i32
    return %arg0, %c0_i32, %c0_i32_0 : i32, i32, i32
  }
  func.func @transform_4(%arg0: i32) -> (i32, i32) {
    %c0_i32 = arith.constant 0 : i32
    %c0_i32_0 = arith.constant 0 : i32
    return %arg0, %c0_i32 : i32, i32
  }
}

</mosaic_0001>

<bundles_post_ra>
// kernel: triton_cross_entropy_loss.1
= control target key start
LH: loop header
LB: loop body
LE: loop exit
PB: predicated region body
PF: predicated region fallthrough
CT: control target
= control target key end

     0   :  { %vm35_vm0 = vcmask 261120   ;;  %v180_v4 = vmov 0   ;;  %s271_s0 = inlined_call_operand.<no memory space> [shape: f32[1,1], index: 0, kind: input, shape index: {}]   ;;  %s272_s1 = inlined_call_operand.vmem [shape: s32[16,1], index: 1, kind: input, shape index: {}]   ;;  %s273_s2 = inlined_call_operand.vmem [shape: f32[16,32], index: 2, kind: input, shape index: {}]   ;;  %s274_s3 = inlined_call_operand.vmem [shape: f32[1,8,128], index: 3, kind: output, shape index: {0}]   ;;  %s275_s4 = inlined_call_operand.hbm [shape: f32[16,32], index: 4, kind: output, shape index: {1}]  }
   0x1   :  { %v18_v0 = vld [vmem:[%s273_s2] sm:$0xff]  ;;  %v19_v1 = vld [vmem:[%s273_s2 + $0x8] sm:$0xff]  ;;  %142 = vset.pattern.permute.xlu1 %v180_v4  ;;  %143 = vset.pattern.permute.xlu0 %v180_v4 }
   0x2   :  { %v218_v2 = vld [vmem:[%s272_s1] sm:$0xff]  ;;  %v36_v3 = vsel %vm35_vm0, %v18_v0, -inf }
   0x3   :  { %11 = vsyncpa [#allocation4], 0  ;;  %37 = vmax.xlane.f32.xlu0 %v36_v3  ;;  %26 = vperm.xlu1 %142, %v218_v2   ;;  %v39_v5 = vsel %vm35_vm0, %v19_v1, -inf  ;;  %v228_v6 = vld [vmem:[%s272_s1 + $0x8] sm:$0xff]  ;;  %v23_v11 = vlaneseq  ;;  %v72_v35 = vstv %s271_s0  ;;  %vm33_vm4 = vcmp.eq.s32.totalorder %v218_v2, 0  ;;  %s181_s0 = smov [#allocation3]  }
   0x4   :  { %vm34_vm3 = vcmp.eq.s32.totalorder %v228_v6, 0  ;;  %vm99_vm5 = vcmask 7168   ;;  %v85_v58 = vsel %vm33_vm4, 1, %v180_v4  ;;  %s121_s23 = sshll.u32 %s181_s0, 4  ;;  %s122_s23 = int_to_ptr.vmem [resolvable:$true] %s121_s23 }
   0x5   :  { %v24_v15 = vand.u32 127, %v23_v11  ;;  %v86_v25 = vsel %vm34_vm3, 1, %v180_v4  ;;  %s156_s24 = scalar_lea.vmem %s122_s23, 256  ;;  %p161_p1 = scmp.lt.s32.totalorder %s122_s23, %s122_s23 }
   0x6   :  { %p157_p0 = scmp.ne.s32.totalorder %s122_s23, %s156_s24  ;;  %p162_p2 = scmp.lt.s32.totalorder %s156_s24, %s156_s24 }
   0x7   :  { %40 = vmax.xlane.f32.xlu0 %v39_v5  ;;  %29 = vperm.xlu1 %142, %v228_v6  }
   0x8   :  { %p163_p3 = por %p162_p2, %p161_p1 }
   0xa   :  { %p164_p4 = pnand %p163_p3, %p157_p0 }
  0x82   :  { %v27_v14 = vpop.permute.xlu1 %26 }
  0x83   :  { %vm31_vm1 = vcmp.eq.s32.totalorder %v24_v15, %v27_v14 }
  0x84   :  { %v62_v18 = vsel %vm31_vm1, %v18_v0, 0.0 }
  0x85   :  { %v64_v20 = vsel %vm35_vm0, %v62_v18, 0.0 }
  0x86   :  { %v30_v16 = vpop.permute.xlu1 %29 }
  0x87   :  { %vm32_vm2 = vcmp.eq.s32.totalorder %v24_v15, %v30_v16 }
  0x88   :  { %v63_v22 = vsel %vm32_vm2, %v19_v1, 0.0 }
  0x89   :  { %v67_v24 = vsel %vm35_vm0, %v63_v22, 0.0 }
  0x90   :  { %v38_v7 = vpop.xlane.xlu0 %37 }
  0x91   :  { %v42_v8 = vsub.f32 %v18_v0, %v38_v7 }
  0x93   :  { %v44_v9 = vmul.f32 1.442695, %v42_v8 }
  0x94   :  { %v41_v10 = vpop.xlane.xlu0 %40 }
  0x95   :  { %144 = vpow2.f32 %v44_v9  ;;  %v43_v12 = vsub.f32 %v19_v1, %v41_v10 }
  0x97   :  { %v46_v13 = vmul.f32 1.442695, %v43_v12 }
  0x99   :  { %146 = vpow2.f32 %v46_v13 }
  0x9f   :  { %v145_v17 = vpop.eup %144 }
  0xa0   :  { %v48_v19 = vsel %vm35_vm0, %v145_v17, 0.0 }
  0xa1   :  { %49 = vadd.xlane.f32.xlu0 %v48_v19 }
  0xa3   :  { %v147_v21 = vpop.eup %146 }
  0xa4   :  { %v51_v23 = vsel %vm35_vm0, %v147_v21, 0.0 }
  0xa5   :  { %52 = vadd.xlane.f32.xlu1 %v51_v23  ;;  %65 = vadd.xlane.f32.xlu0 %v64_v20 }
  0xa9   :  { %68 = vadd.xlane.f32.xlu0 %v67_v24 }
  0xb6   :  { %91 = vperm.xlu1 %142, %v86_v25  }
 0x12e   :  { %v50_v26 = vpop.xlane.xlu0 %49 }
 0x12f   :  { %148 = vlog2.f32 %v50_v26 }
 0x130   :  { %150 = vrcp.f32 %v50_v26 }
 0x132   :  { %v53_v27 = vpop.xlane.xlu1 %52  ;;  %v66_v31 = vpop.xlane.xlu0 %65 }
 0x133   :  { %152 = vlog2.f32 %v53_v27 }
 0x134   :  { %154 = vrcp.f32 %v53_v27 }
 0x136   :  { %v69_v46 = vpop.xlane.xlu0 %68  ;;  %v92_v47 = vpop.permute.xlu1 %91 }
 0x137   :  { %vm94_vm6 = vcmp.eq.s32.totalorder %v92_v47, 1 }
 0x139   :  { %v149_v28 = vpop.eup %148 }
 0x13a   :  { %v151_v29 = vpop.eup %150  ;;  %v55_v30 = vmul.f32 0.6931472, %v149_v28 }
 0x13b   :  { %v77_v32 = vmul.f32 %v151_v29, %v145_v17 }
 0x13c   :  { %v58_v33 = vadd.f32 %v55_v30, %v38_v7 }
 0x13d   :  { %v153_v34 = vpop.eup %152  ;;  %v134_v36 = vadd.f32 -1.0, %v77_v32 }
 0x13e   :  { %v155_v37 = vpop.eup %154  ;;  %v70_v38 = vsub.f32 %v58_v33, %v66_v31  ;;  %v57_v39 = vmul.f32 0.6931472, %v153_v34 }
 0x13f   :  { %v78_v40 = vmul.f32 %v155_v37, %v147_v21  ;;  %v81_v41 = vsel %vm31_vm1, %v134_v36, %v77_v32 }
 0x140   :  { %v73_v42 = vmul.f32 %v72_v35, %v70_v38  ;;  %v59_v43 = vadd.f32 %v57_v39, %v41_v10  ;;  %v83_v44 = vmul.f32 %v81_v41, %v72_v35 }
 0x141   :  { %v135_v45 = vadd.f32 -1.0, %v78_v40 }
 0x142   :  { %v71_v48 = vsub.f32 %v59_v43, %v69_v46  ;;  %v75_v52 = vsel %vm33_vm4, 0.0, %v73_v42 }
 0x143   :  { %v82_v49 = vsel %vm32_vm2, %v135_v45, %v78_v40  ;;  %v100_v55 = vsel %vm99_vm5, %v75_v52, 0.0 }
 0x144   :  { %v84_v50 = vmul.f32 %v82_v49, %v72_v35  ;;  %v74_v51 = vmul.f32 %v72_v35, %v71_v48 }
 0x146   :  { %v96_v53 = vsel %vm94_vm6, 0.0, %v84_v50  ;;  %v76_v54 = vsel %vm34_vm3, 0.0, %v74_v51 }
 0x147   :  { %98 = vst.msk [vmem:[#allocation3 + $0x8] sm:$0xff] %vm35_vm0, %v96_v53  ;;  %v101_v56 = vsel %vm99_vm5, %v76_v54, 0.0 }
 0x148   :  { %v102_v57 = vadd.f32 %v101_v56, %v100_v55 }
 0x14a   :  { %103 = vadd.xlane.f32.xlu0 %v102_v57 }
 0x160   :  { %88 = vperm.xlu0 %143, %v85_v58  }
 0x1d7   :  { %v104_v59 = vpop.xlane.xlu0 %103 }
 0x1d8   :  { %v105_v60 = vrot.slane %v104_v59, 4 }
 0x1da   :  { %v106_v61 = vadd.f32 %v105_v60, %v104_v59 }
 0x1dc   :  { %v107_v62 = vrot.slane %v106_v61, 2 }
 0x1de   :  { %v108_v63 = vadd.f32 %v107_v62, %v106_v61 }
 0x1df   :  { %v89_v0 = vpop.permute.xlu0 %88 }
 0x1e0   :  { %vm93_vm7 = vcmp.eq.s32.totalorder %v89_v0, 1  ;;  %v109_v1 = vrot.slane %v108_v63, 1 }
 0x1e1   :  { %v95_v3 = vsel %vm93_vm7, 0.0, %v83_v44 }
 0x1e2   :  { %97 = vst.msk [vmem:[#allocation3] sm:$0xff] %vm35_vm0, %v95_v3  ;;  %v110_v5 = vadd.f32 %v109_v1, %v108_v63 }
 0x1e3   :  { %167 = shalt.err (!%p164_p4)
}
 0x1e4   :  { %s168_s27 = scalar_lea.hbm %s275_s4, 256 }
 0x1e5   :  { %p169_p5 = scmp.ne.s32.totalorder %s275_s4, %s168_s27  ;;  %p172_p6 = scmp.lt.u32.totalorder %s168_s27, %s275_s4 }
 0x1e7   :  { %p174_p7 = pnand %p172_p6, %p169_p5 }
 0x1e9   :  { %177 = shalt.err (!%p174_p7)
}
 0x1ea   :  { %s182_s6 = smov 128   ;;  %s183_s7 = smov 8   ;;  %136 = vpush %v110_v5 }
 0x1eb   :  { %127 = dma.vmem_to_hbm [thread:$0]  %s122_s23, 256, %s275_s4, [#allocation4], %s182_s6, %s182_s6, %s183_s7  }
 0x21b   :  { %s137_s10 = spop %136 }
 0x21c   :  { %v112_v2 = vstv %s137_s10 }
 0x21d   :  { %113 = vst [vmem:[%s274_s3] sm:$0xff] %v112_v2 }
 0x21e   :  { %178 = dma.done.wait [#allocation4], 256  }
 0x21f   :  { %179 = vsyncadd [#allocation4], 4294967040 }
 0x220   :  { %133 = vsyncpa [#allocation4], 1 }

</bundles_post_ra>
